<compile_context>
chip_gen: v7x
topology: tpu7x:2x2x1
jax: 0.10.0
libtpu: 0.0.40
codegen_flags: <defaults>
</compile_context>

<pallas_src>
import jax
import jax.numpy as jnp
import numpy as np
from jax.experimental import pallas as pl
from jax.experimental.pallas import tpu as pltpu

EPS = 1e-5


def resblock_kernel(x_ref, scale_ref, shift_ref, bias_ref, band_ref,
                    o_ref, fpad_ref):
    # x_ref:     [1, H, W*C]     input slab for one sample (lane-dense)
    # scale_ref: [1, 1, W*C]     fused BN+FiLM scale, tiled over W
    # shift_ref: [1, 1, W*C]     fused BN+FiLM shift, tiled over W
    # bias_ref:  [1, W*C]        conv bias, tiled over W
    # band_ref:  [3, W*C, W*C]   banded conv-weight matrices (one per ky tap)
    # o_ref:     [1, H, W*C]     output slab
    # fpad_ref:  [H+2, W*C]      VMEM scratch: H-zero-padded activation
    H = x_ref.shape[1]
    WC = x_ref.shape[2]

    x = x_ref[0]                           # [H, WC]
    scale = scale_ref[0]                   # [1, WC]
    shift = shift_ref[0]                   # [1, WC]

    # Fused BatchNorm (hoisted stats) + FiLM + ReLU: one lane-dense FMA + max.
    f = jnp.maximum(x * scale + shift, 0.0)

    # Zero-pad along H via the scratch buffer (one interior store, no concats).
    zero_row = jnp.zeros((1, WC), jnp.float32)
    fpad_ref[0:1, :] = zero_row
    fpad_ref[H + 1:H + 2, :] = zero_row
    fpad_ref[1:H + 1, :] = f

    # 3x3 conv as 3 banded matmuls: W- and C-contractions folded into K = W*C,
    # the three ky taps are sublane-offset views of the padded scratch.
    band = band_ref[...]
    # TODO(synk): cast matmul operands to bf16 on v6e/v7x at production channel
    # counts; kept in f32 here so the check stays within 1e-4 of the reference.
    acc = jnp.dot(fpad_ref[0:H, :], band[0], preferred_element_type=jnp.float32)
    acc = acc + jnp.dot(f, band[1], preferred_element_type=jnp.float32)
    acc = acc + jnp.dot(fpad_ref[2:H + 2, :], band[2],
                        preferred_element_type=jnp.float32)

    # Residual + conv bias: single unmasked full-width store.
    o_ref[0] = x + acc + bias_ref[...]


def resblock_forward(x_nchw, y, emb_w, conv_w, conv_b):
    """x_nchw: [N, C, H, W] f32, y: [N] int32, emb_w: [n_classes, 2C],
    conv_w: [Cout, Cin, 3, 3] (OIHW), conv_b: [Cout]."""
    N, C, H, W = x_nchw.shape
    WC = W * C

    # TODO(synk): keep the surrounding model NHWC end-to-end to drop these two
    # full HBM-round-trip transposes; kept here to preserve the NCHW interface.
    x_nhwc = jnp.transpose(x_nchw, (0, 2, 3, 1))            # [N, H, W, C]
    x_slab = x_nhwc.reshape(N, H, WC)                        # lane-dense slab

    # --- BatchNorm2d batch statistics, hoisted (must span the full batch;
    #     computing them per-tile would silently diverge). Two-pass biased var.
    mean = jnp.mean(x_nhwc, axis=(0, 1, 2))                  # [C]
    var = jnp.mean((x_nhwc - mean) ** 2, axis=(0, 1, 2))     # [C]
    inv_std = jax.lax.rsqrt(var + EPS)

    # --- FiLM params (embedding gather = glue), fused with BN into one affine ---
    e = emb_w[y]                                              # [N, 2C]
    alpha, beta = e[:, :C], e[:, C:]
    scale = inv_std[None, :] * (1.0 + beta)                   # [N, C]
    shift = alpha - mean[None, :] * scale                     # [N, C]
    scale_slab = jnp.tile(scale, (1, W)).reshape(N, 1, WC)    # [N, 1, W*C]
    shift_slab = jnp.tile(shift, (1, W)).reshape(N, 1, WC)
    bias_tile = jnp.tile(conv_b, W)[None, :]                  # [1, W*C]

    # --- Banded conv-weight matrices:
    #     band[ky][j*C+ci, w*C+co] = W_hwio[ky, kx, ci, co] where j = w + kx - 1
    #     (zero outside the band), so one [H, W*C] @ [W*C, W*C] matmul performs
    #     the kx and ci contractions with W-boundary zero-padding built in. ---
    w_hwio = jnp.transpose(conv_w, (2, 3, 1, 0)).astype(jnp.float32)  # [ky,kx,ci,co]
    band = jnp.stack([
        sum(jnp.kron(jnp.eye(W, k=1 - kx, dtype=jnp.float32), w_hwio[ky, kx])
            for kx in range(3))
        for ky in range(3)
    ])                                                        # [3, W*C, W*C]

    out_slab = pl.pallas_call(
        resblock_kernel,
        out_shape=jax.ShapeDtypeStruct((N, H, WC), jnp.float32),
        grid_spec=pltpu.PrefetchScalarGridSpec(
            num_scalar_prefetch=0,
            grid=(N,),                        # BN stats hoisted -> tiles independent
            in_specs=[
                pl.BlockSpec((1, H, WC), lambda n: (n, 0, 0)),
                pl.BlockSpec((1, 1, WC), lambda n: (n, 0, 0)),
                pl.BlockSpec((1, 1, WC), lambda n: (n, 0, 0)),
                pl.BlockSpec((1, WC), lambda n: (0, 0)),
                pl.BlockSpec((3, WC, WC), lambda n: (0, 0, 0)),
            ],
            out_specs=pl.BlockSpec((1, H, WC), lambda n: (n, 0, 0)),
            scratch_shapes=[pltpu.VMEM((H + 2, WC), jnp.float32)],
        ),
        compiler_params=pltpu.CompilerParams(
            dimension_semantics=("parallel",),   # v7x: shard batch across the 2 TCs
            vmem_limit_bytes=32 * 1024 * 1024,   # sized for v7x's smaller VMEM
        ),
    )(x_slab, scale_slab, shift_slab, bias_tile, band)

    out = out_slab.reshape(N, H, W, C)
    return jnp.transpose(out, (0, 3, 1, 2))                   # back to NCHW


def resblock_ref(x, y, emb_w, conv_w, conv_b):
    """Pure-JAX reference (NCHW) for the numerical check."""
    C = x.shape[1]
    mean = jnp.mean(x, axis=(0, 2, 3), keepdims=True)
    var = jnp.mean((x - mean) ** 2, axis=(0, 2, 3), keepdims=True)
    xn = (x - mean) * jax.lax.rsqrt(var + EPS)
    e = emb_w[y]
    alpha = e[:, :C][:, :, None, None]
    beta = e[:, C:][:, :, None, None]
    f = jnp.maximum(alpha + xn * (1.0 + beta), 0.0)
    conv = jax.lax.conv_general_dilated(
        f, conv_w, window_strides=(1, 1), padding=((1, 1), (1, 1)),
        dimension_numbers=('NCHW', 'OIHW', 'NCHW'))
    return x + conv + conv_b[None, :, None, None]


if __name__ == "__main__":
    N, C, H, W = 2, 8, 16, 16          # W*C = 128 -> exactly one lane tile wide
    n_classes = 10

    key = jax.random.PRNGKey(0)
    kx, ky, ke, kw, kb = jax.random.split(key, 5)

    x = jax.random.normal(kx, (N, C, H, W), dtype=jnp.float32)
    y = jax.random.randint(ky, (N,), 0, n_classes, dtype=jnp.int32)

    # Deterministic parameter init (shapes match nn.Embedding / nn.Conv2d).
    emb_w = jax.random.normal(ke, (n_classes, 2 * C), dtype=jnp.float32)
    fan_in = C * 3 * 3
    bound = 1.0 / np.sqrt(fan_in)
    conv_w = jax.random.uniform(kw, (C, C, 3, 3), minval=-bound, maxval=bound,
                                dtype=jnp.float32)
    conv_b = jax.random.uniform(kb, (C,), minval=-bound, maxval=bound,
                                dtype=jnp.float32)

    out = jax.block_until_ready(resblock_forward(x, y, emb_w, conv_w, conv_b))
    ref = jax.block_until_ready(resblock_ref(x, y, emb_w, conv_w, conv_b))

    np.testing.assert_allclose(np.asarray(out), np.asarray(ref),
                               rtol=1e-4, atol=1e-4)
    print("KERNEL_OK")
</pallas_src>

<mosaic_0001>
module attributes {stable_mosaic.version = 11 : i64} {
  func.func @resblock_kernel(%arg0: i32, %arg1: memref<1x16x128xf32, #tpu.memory_space<vmem>>, %arg2: memref<1x1x128xf32, #tpu.memory_space<vmem>>, %arg3: memref<1x1x128xf32, #tpu.memory_space<vmem>>, %arg4: memref<1x128xf32, #tpu.memory_space<vmem>>, %arg5: memref<3x128x128xf32, #tpu.memory_space<vmem>>, %arg6: memref<1x16x128xf32, #tpu.memory_space<vmem>>, %arg7: memref<18x128xf32, #tpu.memory_space<vmem>>) attributes {dimension_semantics = [#tpu.dimension_semantics<parallel>], iteration_bounds = array<i64: 2>, scalar_prefetch = 0 : i64, scratch_operands = 1 : i64, tpu.core_type = #tpu.core_type<tc>, window_params = [{transform_indices = @transform_0, window_bounds = array<i64: 1, 16, 128>}, {transform_indices = @transform_1, window_bounds = array<i64: 1, 1, 128>}, {transform_indices = @transform_2, window_bounds = array<i64: 1, 1, 128>}, {pipeline_mode = #tpu.pipeline_mode<synchronous>, transform_indices = @transform_3, window_bounds = array<i64: 1, 128>}, {pipeline_mode = #tpu.pipeline_mode<synchronous>, transform_indices = @transform_4, window_bounds = array<i64: 3, 128, 128>}, {transform_indices = @transform_5, window_bounds = array<i64: 1, 16, 128>}]} {
    %c0 = arith.constant 0 : index
    %c0_0 = arith.constant 0 : index
    %c0_1 = arith.constant 0 : index
    %0 = vector.load %arg1[%c0, %c0_0, %c0_1] : memref<1x16x128xf32, #tpu.memory_space<vmem>>, vector<1x16x128xf32>
    %1 = vector.shape_cast %0 : vector<1x16x128xf32> to vector<16x128xf32>
    %c0_2 = arith.constant 0 : index
    %c0_3 = arith.constant 0 : index
    %c0_4 = arith.constant 0 : index
    %2 = vector.load %arg2[%c0_2, %c0_3, %c0_4] : memref<1x1x128xf32, #tpu.memory_space<vmem>>, vector<1x1x128xf32>
    %3 = vector.shape_cast %2 : vector<1x1x128xf32> to vector<1x128xf32>
    %c0_5 = arith.constant 0 : index
    %c0_6 = arith.constant 0 : index
    %c0_7 = arith.constant 0 : index
    %4 = vector.load %arg3[%c0_5, %c0_6, %c0_7] : memref<1x1x128xf32, #tpu.memory_space<vmem>>, vector<1x1x128xf32>
    %5 = vector.shape_cast %4 : vector<1x1x128xf32> to vector<1x128xf32>
    %6 = vector.broadcast %3 : vector<1x128xf32> to vector<16x128xf32>
    %7 = arith.mulf %1, %6 : vector<16x128xf32>
    %8 = vector.broadcast %5 : vector<1x128xf32> to vector<16x128xf32>
    %9 = arith.addf %7, %8 : vector<16x128xf32>
    %cst = arith.constant 0.000000e+00 : f32
    %10 = vector.broadcast %cst : f32 to vector<16x128xf32>
    %11 = arith.maximumf %9, %10 : vector<16x128xf32>
    %cst_8 = arith.constant 0.000000e+00 : f32
    %12 = vector.broadcast %cst_8 : f32 to vector<1x128xf32>
    %c0_9 = arith.constant 0 : index
    %c0_10 = arith.constant 0 : index
    %13 = vector.load %arg7[%c0_9, %c0_10] : memref<18x128xf32, #tpu.memory_space<vmem>>, vector<1x128xf32>
    tpu.vector_store %arg7[%c0_9, %c0_10], %12 {strides = array<i32>} : memref<18x128xf32, #tpu.memory_space<vmem>>, vector<1x128xf32>,
    %c17 = arith.constant 17 : index
    %c0_11 = arith.constant 0 : index
    %14 = vector.load %arg7[%c17, %c0_11] : memref<18x128xf32, #tpu.memory_space<vmem>>, vector<1x128xf32>
    tpu.vector_store %arg7[%c17, %c0_11], %12 {strides = array<i32>} : memref<18x128xf32, #tpu.memory_space<vmem>>, vector<1x128xf32>,
    %c1 = arith.constant 1 : index
    %c0_12 = arith.constant 0 : index
    %15 = vector.load %arg7[%c1, %c0_12] : memref<18x128xf32, #tpu.memory_space<vmem>>, vector<16x128xf32>
    tpu.vector_store %arg7[%c1, %c0_12], %11 {strides = array<i32>} : memref<18x128xf32, #tpu.memory_space<vmem>>, vector<16x128xf32>,
    %c0_13 = arith.constant 0 : index
    %c0_14 = arith.constant 0 : index
    %c0_15 = arith.constant 0 : index
    %16 = vector.load %arg5[%c0_13, %c0_14, %c0_15] : memref<3x128x128xf32, #tpu.memory_space<vmem>>, vector<3x128x128xf32>
    %c0_16 = arith.constant 0 : index
    %c0_17 = arith.constant 0 : index
    %17 = vector.load %arg7[%c0_16, %c0_17] : memref<18x128xf32, #tpu.memory_space<vmem>>, vector<16x128xf32>
    %18 = vector.extract_strided_slice %16 {offsets = [0, 0, 0], sizes = [1, 128, 128], strides = [1, 1, 1]} : vector<3x128x128xf32> to vector<1x128x128xf32>
    %19 = vector.shape_cast %18 : vector<1x128x128xf32> to vector<128x128xf32>
    %cst_18 = arith.constant dense<0.000000e+00> : vector<16x128xf32>
    %20 = tpu.matmul %17, %19, %cst_18 {dimension_numbers = #tpu.dot_dimension_numbers<[1], [0], [0], [1], [0, 0, 1, 1], [], []>} : vector<16x128xf32>, vector<128x128xf32>, vector<16x128xf32> -> vector<16x128xf32>
    %21 = vector.extract_strided_slice %16 {offsets = [1, 0, 0], sizes = [1, 128, 128], strides = [1, 1, 1]} : vector<3x128x128xf32> to vector<1x128x128xf32>
    %22 = vector.shape_cast %21 : vector<1x128x128xf32> to vector<128x128xf32>
    %cst_19 = arith.constant dense<0.000000e+00> : vector<16x128xf32>
    %23 = tpu.matmul %11, %22, %cst_19 {dimension_numbers = #tpu.dot_dimension_numbers<[1], [0], [0], [1], [0, 0, 1, 1], [], []>} : vector<16x128xf32>, vector<128x128xf32>, vector<16x128xf32> -> vector<16x128xf32>
    %24 = arith.addf %20, %23 : vector<16x128xf32>
    %c2 = arith.constant 2 : index
    %c0_20 = arith.constant 0 : index
    %25 = vector.load %arg7[%c2, %c0_20] : memref<18x128xf32, #tpu.memory_space<vmem>>, vector<16x128xf32>
    %26 = vector.extract_strided_slice %16 {offsets = [2, 0, 0], sizes = [1, 128, 128], strides = [1, 1, 1]} : vector<3x128x128xf32> to vector<1x128x128xf32>
    %27 = vector.shape_cast %26 : vector<1x128x128xf32> to vector<128x128xf32>
    %cst_21 = arith.constant dense<0.000000e+00> : vector<16x128xf32>
    %28 = tpu.matmul %25, %27, %cst_21 {dimension_numbers = #tpu.dot_dimension_numbers<[1], [0], [0], [1], [0, 0, 1, 1], [], []>} : vector<16x128xf32>, vector<128x128xf32>, vector<16x128xf32> -> vector<16x128xf32>
    %29 = arith.addf %24, %28 : vector<16x128xf32>
    %30 = arith.addf %1, %29 : vector<16x128xf32>
    %c0_22 = arith.constant 0 : index
    %c0_23 = arith.constant 0 : index
    %31 = vector.load %arg4[%c0_22, %c0_23] : memref<1x128xf32, #tpu.memory_space<vmem>>, vector<1x128xf32>
    %32 = vector.broadcast %31 : vector<1x128xf32> to vector<16x128xf32>
    %33 = arith.addf %30, %32 : vector<16x128xf32>
    %c0_24 = arith.constant 0 : index
    %c0_25 = arith.constant 0 : index
    %c0_26 = arith.constant 0 : index
    %34 = vector.load %arg6[%c0_24, %c0_25, %c0_26] : memref<1x16x128xf32, #tpu.memory_space<vmem>>, vector<1x16x128xf32>
    %35 = vector.shape_cast %34 : vector<1x16x128xf32> to vector<16x128xf32>
    %36 = vector.shape_cast %33 : vector<16x128xf32> to vector<1x16x128xf32>
    tpu.vector_store %arg6[%c0_24, %c0_25, %c0_26], %36 {strides = array<i32>} : memref<1x16x128xf32, #tpu.memory_space<vmem>>, vector<1x16x128xf32>,
    return
  }
  func.func @transform_0(%arg0: i32) -> (i32, i32, i32) {
    %c0_i32 = arith.constant 0 : i32
    %c0_i32_0 = arith.constant 0 : i32
    %c0_i32_1 = arith.constant 0 : i32
    return %arg0, %c0_i32, %c0_i32_0 : i32, i32, i32
  }
  func.func @transform_1(%arg0: i32) -> (i32, i32, i32) {
    %c0_i32 = arith.constant 0 : i32
    %c0_i32_0 = arith.constant 0 : i32
    %c0_i32_1 = arith.constant 0 : i32
    return %arg0, %c0_i32, %c0_i32_0 : i32, i32, i32
  }
  func.func @transform_2(%arg0: i32) -> (i32, i32, i32) {
    %c0_i32 = arith.constant 0 : i32
    %c0_i32_0 = arith.constant 0 : i32
    %c0_i32_1 = arith.constant 0 : i32
    return %arg0, %c0_i32, %c0_i32_0 : i32, i32, i32
  }
  func.func @transform_3(%arg0: i32) -> (i32, i32) {
    %c0_i32 = arith.constant 0 : i32
    %c0_i32_0 = arith.constant 0 : i32
    %c0_i32_1 = arith.constant 0 : i32
    return %c0_i32, %c0_i32_0 : i32, i32
  }
  func.func @transform_4(%arg0: i32) -> (i32, i32, i32) {
    %c0_i32 = arith.constant 0 : i32
    %c0_i32_0 = arith.constant 0 : i32
    %c0_i32_1 = arith.constant 0 : i32
    %c0_i32_2 = arith.constant 0 : i32
    return %c0_i32, %c0_i32_0, %c0_i32_1 : i32, i32, i32
  }
  func.func @transform_5(%arg0: i32) -> (i32, i32, i32) {
    %c0_i32 = arith.constant 0 : i32
    %c0_i32_0 = arith.constant 0 : i32
    %c0_i32_1 = arith.constant 0 : i32
    return %arg0, %c0_i32, %c0_i32_0 : i32, i32, i32
  }
}

</mosaic_0001>

<bundles_post_ra>
// kernel: tpu_custom_call.1
= control target key start
LH: loop header
LB: loop body
LE: loop exit
PB: predicated region body
PF: predicated region fallthrough
CT: control target
= control target key end

     0   :  { %10 = vsyncpa [#allocation4], 0  ;;  %s1470_s0 = inlined_call_operand.hbm [shape: f32[2,16,128], index: 0, kind: input, shape index: {}]   ;;  %s1471_s1 = inlined_call_operand.vmem [shape: f32[2,1,128], index: 1, kind: input, shape index: {}]   ;;  %s1472_s2 = inlined_call_operand.vmem [shape: f32[2,1,128], index: 2, kind: input, shape index: {}]   ;;  %s1473_s3 = inlined_call_operand.vmem [shape: f32[1,128], index: 3, kind: input, shape index: {}]   ;;  %s1474_s4 = inlined_call_operand.hbm [shape: f32[3,128,128], index: 4, kind: input, shape index: {}]   ;;  %s1475_s5 = inlined_call_operand.hbm [shape: f32[2,16,128], index: 5, kind: output, shape index: {}]  }
   0x1   :  { %12 = vsyncpa [#allocation4 + $0x1], 0 }
   0x2   :  { %13 = vsyncpa [#allocation7], 0 }
   0x3   :  { %14 = vsyncpa [#allocation5], 0 }
   0x4   :  { %16 = vsyncpa [#allocation5 + $0x1], 0  ;;  %s1229_s18 = smov 0   ;;  %s1231_s19 = smov 0  }
   0x5   :  { %s1233_s20 = smov 0   ;;  %s1235_s21 = smov 0  }
   0x6 LB: > { %s1250_s22 = sadd.s32 4294967295, %s1189_s21   ;;  %s719_s23 = sadd.s32 4294967294, %s1189_s21   ;;  %s1189_s21 = sphi %s1235_s21, %s1495_s21   ;;  %s1185_s20 = sphi %s1233_s20, %s1494_s20   ;;  %s1181_s19 = sphi %s1231_s19, %s1493_s19   ;;  %s1177_s18 = sphi %s1229_s18, %s1492_s18  }
   0x7   : > { %p42_p0 = scmp.ne.s32.totalorder %s1181_s19, %s1177_s18  ;;  %p1476_p1 = scmp.eq.s32.totalorder %s1250_s22, 0 }
   0x8   : > { %p166_p3 = scmp.eq.s32.totalorder %s719_s23, 1  ;;  %p720_p5 = scmp.ge.s32.totalorder %s1189_s21, 1 }
   0x9   : > { %p1259_p4 = por %p1476_p1, %p42_p0  ;;  %p173_p7 = scmp.lt.s32.totalorder %s1189_s21, 3 }
   0xa   : > { %p1264_p6 = por %p166_p3, %p42_p0  ;;  %s1191_s27 = smov [#allocation6]  }
   0xb   : > { %s1479_s24 = scalar_select %p1259_p4, 1, 0 }
   0xc   : > { %s1480_s25 = scalar_select %p1264_p6, 1, 0 }
   0xd   : > { %p1269_p8 = pnand %p720_p5, %p173_p7  ;;  %s188_s28 = sshll.u32 %s1191_s27, 4  ;;  %s1273_s28 = int_to_ptr.vmem [resolvable:$true] %s188_s28 }
   0xe   : > { %s1285_s30 = sadd.s32 1, %s1189_s21   ;;  %s29_s6 = sadd.s32 1, %s1185_s20 }
   0xf   : > { %s1481_s26 = scalar_select %p1269_p8, 1, 0 }
  0x10   : > { %p1007_p9 = pneg %p1269_p8  ;;  %s26_s7 = ssub.s32 %s1189_s21, %s1285_s30 }
  0x11   : > { %s1061_s10 = scalar_lea.hbm %s1474_s4, 6144 }
  0x12   : > { %p1280_p11 = pnand %p1007_p9, %p1476_p1  ;;  %p1062_p12 = scmp.ne.s32.totalorder %s1474_s4, %s1061_s10 }
  0x13   : > { %p1068_p5 = scmp.lt.u32.totalorder %s1061_s10, %s1474_s4 }
  0x14   : > { %p1063_p13 = pneg %p1280_p11 }
  0x16   : > { %p1064_p0 = pnand %p1063_p13, %p1062_p12 }
  0x18   : > { %p1065_p3 = pneg %p1064_p0 }
  0x1a   : > { %p1070_p7 = pnand %p1068_p5, %p1065_p3 }
  0x1c   : > { %1073 = shalt.err (!%p1070_p7)
}
  0x1d   : > { %s1074_s15 = scalar_lea.vmem %s1273_s28, 6144  ;;  %p1082_p2 = scmp.lt.s32.totalorder %s1273_s28, %s1273_s28 }
  0x1e   : > { %p1075_p9 = scmp.ne.s32.totalorder %s1273_s28, %s1074_s15  ;;  %p1083_p6 = scmp.lt.s32.totalorder %s1074_s15, %s1074_s15 }
  0x20   : > { %p1077_p10 = pnand %p1075_p9, %p1063_p13  ;;  %p1084_p4 = por %p1083_p6, %p1082_p2 }
  0x22   : > { %p1078_p1 = pneg %p1077_p10 }
  0x24   : > { %p1085_p8 = pnand %p1084_p4, %p1078_p1 }
  0x26   : > { %1088 = shalt.err (!%p1085_p8)
}
  0x27   : > { %s1192_s16 = smov 128   ;;  %s1193_s17 = smov 8  }
  0x28   : > { %1010 = dma.hbm_to_vmem [thread:$0]  (!%p1280_p11), %s1474_s4, 6144, %s1273_s28, [#allocation7], %s1192_s16, %s1192_s16, %s1193_s17  }
  0x29   : > { %p27_p1 = scmp.eq.s32.totalorder %s26_s7, 0  ;;  %p36_p2 = scmp.ne.s32.totalorder %s1185_s20, %s1181_s19 }
  0x2a   : > { %p37_p4 = scmp.eq.s32.totalorder %s1189_s21, 0  ;;  %p1020_p6 = scmp.lt.s32.totalorder %s1189_s21, 2 }
  0x2b   : > { %s1319_s8 = scalar_select %p27_p1, %s1185_s20, %s29_s6  }
  0x2c   : > { %p38_p8 = por %p37_p4, %p36_p2  ;;  %p1483_p10 = scmp.eq.s32.totalorder %s1250_s22, 1 }
  0x2d   : > { %s202_s29 = sand.u32 1, %s1185_s20   ;;  %s738_s10 = sshll.u32 %s1189_s21, 8 }
  0x2e   : > { %p1323_p12 = por %p1483_p10, %p36_p2  ;;  %s723_s11 = sshll.u32 %s202_s29, 4 }
  0x2f   : > { %s1332_s14 = scalar_lea.hbm %s1470_s0, %s738_s10  ;;  %s206_s28 = scalar_lea.vmem [#allocation3], %s723_s11 }
  0x30   : > { %s213_s6 = sshll.u32 %s206_s28, 4  ;;  %p1334_p11 = pnand %p1020_p6, %p38_p8  ;;  %s1338_s6 = int_to_ptr.vmem [resolvable:$true] %s213_s6 }
  0x31   : > { %s1340_s15 = scalar_lea.sflag [#allocation4], %s202_s29  ;;  %s1089_s23 = scalar_lea.hbm %s1332_s14, 256 }
  0x32   : > { %p1090_p13 = scmp.ne.s32.totalorder %s1332_s14, %s1089_s23  ;;  %p1091_p0 = pneg %p1334_p11 }
  0x33   : > { %s1094_s11 = scalar_lea.hbm %s1470_s0, 512  ;;  %p1095_p7 = scmp.lt.u32.totalorder %s1332_s14, %s1470_s0 }
  0x34   : > { %p1092_p3 = pnand %p1091_p0, %p1090_p13  ;;  %p1096_p9 = scmp.lt.u32.totalorder %s1094_s11, %s1089_s23 }
  0x35   : > { %p1098_p2 = scmp.lt.u32.totalorder %s1089_s23, %s1332_s14 }
  0x36   : > { %p1093_p5 = pneg %p1092_p3  ;;  %p1097_p1 = por %p1096_p9, %p1095_p7 }
  0x38   : > { %p1099_p4 = por %p1098_p2, %p1097_p1 }
  0x3a   : > { %p1100_p6 = pnand %p1099_p4, %p1093_p5 }
  0x3c   : > { %1103 = shalt.err (!%p1100_p6)
}
  0x3d   : > { %s1104_s29 = scalar_lea.vmem %s1338_s6, 256  ;;  %s1194_s28 = smov [#allocation3]  }
  0x3e   : > { %p1105_p8 = scmp.ne.s32.totalorder %s1338_s6, %s1104_s29  ;;  %s1109_s27 = sshll.u32 %s1194_s28, 4  ;;  %s1110_s27 = int_to_ptr.vmem [resolvable:$false] %s1109_s27 }
  0x3f   : > { %s1111_s10 = scalar_lea.vmem %s1110_s27, 512  ;;  %p1112_p3 = scmp.lt.s32.totalorder %s1338_s6, %s1110_s27 }
  0x40   : > { %p1107_p10 = pnand %p1105_p8, %p1091_p0  ;;  %p1113_p7 = scmp.lt.s32.totalorder %s1111_s10, %s1104_s29 }
  0x42   : > { %p1108_p13 = pneg %p1107_p10  ;;  %p1114_p9 = por %p1113_p7, %p1112_p3 }
  0x44   : > { %p1115_p1 = pnand %p1114_p9, %p1108_p13 }
  0x46   : > { %1118 = shalt.err (!%p1115_p1)
}
  0x47   : > { %1014 = dma.hbm_to_vmem [thread:$0]  (!%p1334_p11), %s1332_s14, 256, %s1338_s6, %s1340_s15, %s1192_s16, %s1192_s16, %s1193_s17  }
  0x48   : > { %p1486_p0 = scmp.ne.s32.totalorder %s1481_s26, 0 }
  0x49   : > { %s1374_s23 = sand.u32 (!%p1486_p0), 1, %s1181_s19   ;;  %p1487_p5 = scmp.ne.s32.totalorder (!%p1486_p0), %s1479_s24, 0 }
  0x4a   : > { %237 = sbr.rel (%p1486_p0) target bundleno = 386 (0x182), region = 40  ;;  %s727_s11 = sshll.u32 (!%p1486_p0), %s1374_s23, 4 }
  0x4b   : > { %s240_s12 = scalar_lea.sflag (!%p1486_p0), [#allocation4], %s1374_s23  ;;  %s1380_s7 = scalar_lea.vmem (!%p1486_p0), [#allocation3], %s727_s11 }
  0x51   : > { %1164 = dma.done.wait (%p1487_p5), %s240_s12, 256  }
  0x52   : > { %1166 = vsyncadd (%p1487_p5), %s240_s12, 4294967040  ;;  %p1488_p11 = scmp.eq.s32.totalorder %s1250_s22, 0 }
  0x54   : > { %1168 = dma.done.wait (%p1488_p11), [#allocation7], 6144   ;;  %p1489_p2 = pmov %p1488_p11 }
  0x55   : > { %v1195_v0 = vmov 0.0   ;;  %p280_p4 = scmp.lt.s32.totalorder %s1250_s22, 1  ;;  %v312_v1 = vld [vmem:[#allocation6] sm:$0xff]  ;;  %v313_v2 = vld [vmem:[#allocation6 + $0x8] sm:$0xff]  ;;  %v314_v3 = vld [vmem:[#allocation6 + $0x10] sm:$0xff]  ;;  %s279_s13 = scalar_lea.vmem [#allocation8], %s727_s11 }
  0x56   : > { %1170 = vsyncadd (%p1489_p2), [#allocation7], 4294961152  ;;  %308 = vst [vmem:[#allocation2] sm:$0x1] %v1195_v0  ;;  %v931_v4 = vpack.c.bf16 %v313_v2, %v312_v1  ;;  %v315_v5 = vld [vmem:[#allocation6 + $0x18] sm:$0xff]  ;;  %v316_v7 = vld [vmem:[#allocation6 + $0x20] sm:$0xff] }
  0x57   : > { %309 = vst [vmem:[#allocation2 + $0x11] sm:$0x1] %v1195_v0  ;;  %s281_s26 = scalar_select %p280_p4, %s1250_s22, 1  ;;  %v935_v6 = vpack.c.bf16 %v315_v5, %v314_v3  ;;  %v317_v8 = vld [vmem:[#allocation6 + $0x28] sm:$0xff]  ;;  %v318_v9 = vld [vmem:[#allocation6 + $0x30] sm:$0xff]  ;;  %v319_v11 = vld [vmem:[#allocation6 + $0x38] sm:$0xff] }
  0x58   : > { %932 = vmatprep.subr.bf16.mxu0 %v931_v4  ;;  %v939_v10 = vpack.c.bf16 %v317_v8, %v316_v7  ;;  %v328_v12 = vld [vmem:[#allocation6 + $0x80] sm:$0xff]  ;;  %v329_v13 = vld [vmem:[#allocation6 + $0x88] sm:$0xff]  ;;  %v330_v21 = vld [vmem:[#allocation6 + $0x90] sm:$0xff]  ;;  %v943_v23 = vpack.c.bf16 %v319_v11, %v318_v9  ;;  %s618_s29 = sshll.u32 %s279_s13, 4  ;;  %s739_s10 = sshll.u32 %s1250_s22, 8  ;;  %s1420_s29 = int_to_ptr.vmem [resolvable:$true] %s618_s29 }
  0x59   : > { %s282_s17 = scalar_lea.vmem %s1471_s1, %s281_s26  ;;  %s285_s15 = scalar_lea.vmem %s1472_s2, %s281_s26  ;;  %934 = vmatpush3.bf16.msra.mxu0 %v931_v4  ;;  %v899_v14 = vpack.c.bf16 %v329_v13, %v328_v12  ;;  %v1399_v15 = vld [vmem:[%s1380_s7] sm:$0xff]  ;;  %v1403_v19 = vld [vmem:[%s1380_s7 + $0x8] sm:$0xff] }
  0x5a   : > { %936 = vmatprep.subr.bf16.mxu0 %v935_v6  ;;  %v730_v16 = vld [vmem:[%s282_s17] ss:$0 sm:$0xff]  ;;  %v331_v22 = vld [vmem:[#allocation6 + $0x98] sm:$0xff]  ;;  %v332_v26 = vld [vmem:[#allocation6 + $0xa0] sm:$0xff]  ;;  %s1426_s7 = scalar_lea.hbm %s1475_s5, %s739_s10  ;;  %s605_s26 = scalar_lea.sflag [#allocation5], %s1374_s23 }
  0x5b   : > { %v731_v17 = vld [vmem:[%s285_s15] ss:$0 sm:$0xff]  ;;  %v296_v18 = vmul.f32 %v730_v16, %v1399_v15  ;;  %900 = vmatprep.subr.bf16.mxu1 %v899_v14  ;;  %v297_v20 = vmul.f32 %v730_v16, %v1403_v19  ;;  %v903_v25 = vpack.c.bf16 %v331_v22, %v330_v21  ;;  %v320_v28 = vld [vmem:[#allocation6 + $0x40] sm:$0xff]  ;;  %v334_v33 = vld [vmem:[#allocation6 + $0xb0] sm:$0xff]  ;;  %s1119_s22 = scalar_lea.vmem %s1420_s29, 256  ;;  %s1196_s24 = smov [#allocation8]  }
  0x5c   : > { %902 = vmatpush3.bf16.msra.mxu1 %v899_v14  ;;  %v333_v27 = vld [vmem:[#allocation6 + $0xa8] sm:$0xff]  ;;  %v335_v34 = vld [vmem:[#allocation6 + $0xb8] sm:$0xff]  ;;  %v322_v37 = vld [vmem:[#allocation6 + $0x50] sm:$0xff]  ;;  %p1120_p6 = scmp.ne.s32.totalorder %s1420_s29, %s1119_s22  ;;  %s1123_s16 = sshll.u32 %s1196_s24, 4  ;;  %s1124_s16 = int_to_ptr.vmem [resolvable:$false] %s1123_s16 }
  0x5d   : > { %938 = vmatpush3.bf16.msra.mxu0 %v935_v6  ;;  %v304_v24 = vadd.f32 %v731_v17, %v296_v18  ;;  %v321_v29 = vld [vmem:[#allocation6 + $0x48] sm:$0xff]  ;;  %v1406_v30 = vadd.f32 %v731_v17, %v297_v20  ;;  %v907_v31 = vpack.c.bf16 %v333_v27, %v332_v26  ;;  %904 = vmatprep.subr.bf16.mxu1 %v903_v25  ;;  %v323_v38 = vld [vmem:[#allocation6 + $0x58] sm:$0xff]  ;;  %v336_v40 = vld [vmem:[#allocation6 + $0xc0] sm:$0xff]  ;;  %s1125_s17 = scalar_lea.vmem %s1124_s16, 512  ;;  %p1126_p13 = scmp.lt.s32.totalorder %s1420_s29, %s1124_s16 }
  0x5e   : > { %940 = vmatprep.subr.bf16.mxu0 %v939_v10  ;;  %v947_v36 = vpack.c.bf16 %v321_v29, %v320_v28  ;;  %v911_v39 = vpack.c.bf16 %v335_v34, %v334_v33  ;;  %v337_v41 = vld [vmem:[#allocation6 + $0xc8] sm:$0xff]  ;;  %v951_v42 = vpack.c.bf16 %v323_v38, %v322_v37  ;;  %v324_v43 = vld [vmem:[#allocation6 + $0x60] sm:$0xff]  ;;  %v338_v47 = vld [vmem:[#allocation6 + $0xd0] sm:$0xff]  ;;  %p1121_p8 = pnand %p1120_p6, %p1323_p12  ;;  %p1127_p3 = scmp.lt.s32.totalorder %s1125_s17, %s1119_s22 }
  0x5f   : > { %v306_v32 = vmax.f32 %v304_v24, 0.0  ;;  %v307_v35 = vmax.f32 %v1406_v30, 0.0  ;;  %v325_v44 = vld [vmem:[#allocation6 + $0x68] sm:$0xff]  ;;  %v915_v45 = vpack.c.bf16 %v337_v41, %v336_v40  ;;  %v339_v48 = vld [vmem:[#allocation6 + $0xd8] sm:$0xff]  ;;  %v326_v50 = vld [vmem:[#allocation6 + $0x70] sm:$0xff] }
  0x60   : > { %906 = vmatpush3.bf16.msra.mxu1 %v903_v25  ;;  %v955_v49 = vpack.c.bf16 %v325_v44, %v324_v43  ;;  %v327_v51 = vld [vmem:[#allocation6 + $0x78] sm:$0xff]  ;;  %v919_v52 = vpack.c.bf16 %v339_v48, %v338_v47  ;;  %v340_v53 = vld [vmem:[#allocation6 + $0xe0] sm:$0xff]  ;;  %v341_v54 = vld [vmem:[#allocation6 + $0xe8] sm:$0xff]  ;;  %p1122_p10 = pneg %p1121_p8  ;;  %p1128_p7 = por %p1127_p3, %p1126_p13 }
  0x61   : > { %942 = vmatpush3.bf16.msra.mxu0 %v939_v10  ;;  %310 = vst [vmem:[#allocation2 + $0x1] sm:$0xff] %v306_v32  ;;  %311 = vst [vmem:[#allocation2 + $0x9] sm:$0xff] %v307_v35  ;;  %908 = vmatprep.subr.bf16.mxu1 %v907_v31  ;;  %v959_v55 = vpack.c.bf16 %v327_v51, %v326_v50  ;;  %v344_v56 = vld [vmem:[#allocation6 + $0x100] sm:$0xff]  ;;  %v345_v57 = vld [vmem:[#allocation6 + $0x108] sm:$0xff]  ;;  %v923_v58 = vpack.c.bf16 %v341_v54, %v340_v53 }
  0x62   : > { %944 = vmatprep.subr.bf16.mxu0 %v943_v23  ;;  %826 = vmatprep.mubr.f32.mxu1 %v306_v32  ;;  %v342_v59 = vld [vmem:[#allocation6 + $0xf0] sm:$0xff]  ;;  %v343_v60 = vld [vmem:[#allocation6 + $0xf8] sm:$0xff]  ;;  %v963_v61 = vpack.c.bf16 %v345_v57, %v344_v56  ;;  %v348_v4 = vld [vmem:[#allocation6 + $0x120] sm:$0xff]  ;;  %p1129_p9 = pnand %p1128_p7, %p1122_p10 }
  0x63   : > { %v346_v62 = vld [vmem:[#allocation6 + $0x110] sm:$0xff]  ;;  %v347_v63 = vld [vmem:[#allocation6 + $0x118] sm:$0xff]  ;;  %v927_v0 = vpack.c.bf16 %v343_v60, %v342_v59  ;;  %v349_v5 = vld [vmem:[#allocation6 + $0x128] sm:$0xff] }
  0x64   : > { %910 = vmatpush3.bf16.msra.mxu1 %v907_v31  ;;  %v967_v2 = vpack.c.bf16 %v347_v63, %v346_v62  ;;  %v971_v6 = vpack.c.bf16 %v349_v5, %v348_v4  ;;  %v350_v7 = vld [vmem:[#allocation6 + $0x130] sm:$0xff]  ;;  %v351_v8 = vld [vmem:[#allocation6 + $0x138] sm:$0xff]  ;;  %v352_v10 = vld [vmem:[#allocation6 + $0x140] sm:$0xff] }
  0x65   : > { %946 = vmatpush3.bf16.msra.mxu0 %v943_v23  ;;  %912 = vmatprep.subr.bf16.mxu1 %v911_v39  ;;  %v975_v9 = vpack.c.bf16 %v351_v8, %v350_v7  ;;  %v353_v11 = vld [vmem:[#allocation6 + $0x148] sm:$0xff]  ;;  %v354_v13 = vld [vmem:[#allocation6 + $0x150] sm:$0xff]  ;;  %v355_v14 = vld [vmem:[#allocation6 + $0x158] sm:$0xff] }
  0x66   : > { %948 = vmatprep.subr.bf16.mxu0 %v947_v36  ;;  %v979_v12 = vpack.c.bf16 %v353_v11, %v352_v10  ;;  %v983_v16 = vpack.c.bf16 %v355_v14, %v354_v13  ;;  %v356_v17 = vld [vmem:[#allocation6 + $0x160] sm:$0xff]  ;;  %v357_v18 = vld [vmem:[#allocation6 + $0x168] sm:$0xff]  ;;  %v358_v21 = vld [vmem:[#allocation6 + $0x170] sm:$0xff] }
  0x67   : > { %v987_v20 = vpack.c.bf16 %v357_v18, %v356_v17  ;;  %v359_v22 = vld [vmem:[#allocation6 + $0x178] sm:$0xff]  ;;  %v732_v30 = vld [vmem:[%s1473_s3] ss:$0 sm:$0xff] }
  0x68   : > { %v360_v46 = vld [vmem:[#allocation2] sm:$0xff]  ;;  %914 = vmatpush3.bf16.msra.mxu1 %v911_v39  ;;  %v361_v1 = vld [vmem:[#allocation2 + $0x8] sm:$0xff]  ;;  %v991_v23 = vpack.c.bf16 %v359_v22, %v358_v21 }
  0x69   : > { %950 = vmatpush3.bf16.msra.mxu0 %v947_v36  ;;  %861 = vmatprep.mubr.f32.mxu0 %v360_v46  ;;  %v512_v3 = vld [vmem:[#allocation2 + $0x2] sm:$0xff]  ;;  %v513_v24 = vld [vmem:[#allocation2 + $0xa] sm:$0xff] }
  0x6a   : > { %952 = vmatprep.subr.bf16.mxu0 %v951_v42  ;;  %916 = vmatprep.subr.bf16.mxu1 %v915_v45 }
  0x6c   : > { %918 = vmatpush3.bf16.msra.mxu1 %v915_v45 }
  0x6d   : > { %954 = vmatpush3.bf16.msra.mxu0 %v951_v42  ;;  %920 = vmatprep.subr.bf16.mxu1 %v919_v52 }
  0x6e   : > { %956 = vmatprep.subr.bf16.mxu0 %v955_v49 }
  0x70   : > { %922 = vmatpush3.bf16.msra.mxu1 %v919_v52 }
  0x71   : > { %958 = vmatpush3.bf16.msra.mxu0 %v955_v49  ;;  %924 = vmatprep.subr.bf16.mxu1 %v923_v58 }
  0x72   : > { %960 = vmatprep.subr.bf16.mxu0 %v959_v55 }
  0x74   : > { %926 = vmatpush3.bf16.msra.mxu1 %v923_v58 }
  0x75   : > { %962 = vmatpush3.bf16.msra.mxu0 %v959_v55  ;;  %928 = vmatprep.subr.bf16.mxu1 %v927_v0 }
  0x76   : > { %964 = vmatprep.subr.bf16.mxu0 %v963_v61 }
  0x78   : > { %862 = vmatmul.mubr.f32.vlgmr.msra.gmra.mrb[0].mxu0 %v361_v1  ;;  %930 = vmatpush3.bf16.msra.mxu1 %v927_v0 }
  0x79   : > { %966 = vmatpush3.bf16.msra.mxu0 %v963_v61  ;;  %896 = vmatprep.mubr.f32.mxu0 %v512_v3 }
  0x7a   : > { %968 = vmatprep.subr.bf16.mxu0 %v967_v2 }
  0x7b   : > { %827 = vmatmul.mubr.f32.vlgmr.msra.gmra.mrb[0].mxu1 %v307_v35 }
  0x7d   : > { %970 = vmatpush3.bf16.msra.mxu0 %v967_v2 }
  0x7e   : > { %972 = vmatprep.subr.bf16.mxu0 %v971_v6 }
  0x81   : > { %974 = vmatpush3.bf16.msra.mxu0 %v971_v6 }
  0x82   : > { %976 = vmatprep.subr.bf16.mxu0 %v975_v9 }
  0x85   : > { %978 = vmatpush3.bf16.msra.mxu0 %v975_v9 }
  0x86   : > { %980 = vmatprep.subr.bf16.mxu0 %v979_v12 }
  0x89   : > { %982 = vmatpush3.bf16.msra.mxu0 %v979_v12 }
  0x8a   : > { %984 = vmatprep.subr.bf16.mxu0 %v983_v16 }
  0x8d   : > { %986 = vmatpush3.bf16.msra.mxu0 %v983_v16 }
  0x8e   : > { %988 = vmatprep.subr.bf16.mxu0 %v987_v20 }
  0x91   : > { %990 = vmatpush3.bf16.msra.mxu0 %v987_v20 }
  0x92   : > { %992 = vmatprep.subr.bf16.mxu0 %v991_v23 }
  0x95   : > { %994 = vmatpush3.bf16.msra.mxu0 %v991_v23 }
  0x98   : > { %897 = vmatmul.mubr.f32.vlgmr.msra.gmra.mrb[0].mxu0 %v513_v24 }
 0x14e   : > { %v828_v25 = vpop.f32.mrb[0].mxu1 }
 0x14f   : > { %v428_v26 = vpop.f32.mrb[1].mxu1 }
 0x16b   : > { %v898_v27 = vpop.f32.mrb[0].mxu0 }
 0x16c   : > { %v995_v28 = vadd.f32 %v898_v27, %v828_v25  ;;  %v580_v29 = vpop.f32.mrb[1].mxu0 }
 0x16d   : > { %v996_v31 = vadd.f32 %v580_v29, %v428_v26 }
 0x16e   : > { %v592_v32 = vadd.f32 %v995_v28, %v1403_v19 }
 0x16f   : > { %v591_v33 = vadd.f32 %v996_v31, %v1399_v15 }
 0x170   : > { %v601_v34 = vadd.f32 %v732_v30, %v592_v32 }
 0x171   : > { %v600_v35 = vadd.f32 %v732_v30, %v591_v33 }
 0x172   : > { %603 = vst [vmem:[%s279_s13 + $0x8] sm:$0xff] %v601_v34 }
 0x173   : > { %602 = vst [vmem:[%s279_s13] sm:$0xff] %v600_v35 }
 0x174   : > { %1132 = shalt.err (!%p1129_p9)
}
 0x175   : > { %s1133_s14 = scalar_lea.hbm %s1426_s7, 256  ;;  %s1137_s13 = scalar_lea.hbm %s1475_s5, 512 }
 0x176   : > { %p1134_p1 = scmp.ne.s32.totalorder %s1426_s7, %s1133_s14  ;;  %p1138_p11 = scmp.lt.u32.totalorder %s1426_s7, %s1475_s5 }
 0x177   : > { %p1139_p2 = scmp.lt.u32.totalorder %s1137_s13, %s1133_s14  ;;  %p1141_p6 = scmp.lt.u32.totalorder %s1133_s14, %s1426_s7 }
 0x178   : > { %p1135_p0 = pnand %p1134_p1, %p1323_p12 }
 0x179   : > { %p1140_p4 = por %p1139_p2, %p1138_p11 }
 0x17a   : > { %p1136_p5 = pneg %p1135_p0 }
 0x17b   : > { %p1142_p8 = por %p1141_p6, %p1140_p4 }
 0x17d   : > { %p1143_p10 = pnand %p1142_p8, %p1136_p5 }
 0x17f   : > { %1146 = shalt.err (!%p1143_p10)
}
 0x180   : > { %s1197_s10 = smov 128   ;;  %s1198_s11 = smov 8  }
 0x181   : > { %1005 = dma.vmem_to_hbm [thread:$0]  (%p1323_p12), %s1420_s29, 256, %s1426_s7, %s605_s26, %s1197_s10, %s1197_s10, %s1198_s11  }
 0x182 PF: > { %s633_s12 = sand.u32 1, %s1177_s18   ;;  %p1490_p13 = scmp.ne.s32.totalorder %s1480_s25, 0 }
 0x183   : > { %p1491_p3 = scmp.ge.s32.totalorder %s1189_s21, 2  ;;  %s634_s22 = scalar_lea.sflag [#allocation5], %s633_s12 }
 0x185   : > { %p1016_p7 = pnand %p1491_p3, %p1490_p13 }
 0x187   : > { %1172 = dma.done.wait (!%p1016_p7), %s634_s22, 256  }
 0x188   : > { %1174 = vsyncadd (!%p1016_p7), %s634_s22, 4294967040  ;;  %p19_p9 = scmp.ge.s32.totalorder %s1285_s30, 4   ;;  %s1492_s18 = smov %s1181_s19 }
 0x189   : > { %s1493_s19 = smov %s1185_s20  ;;  %s1494_s20 = smov %s1319_s8 }
 0x18a   : > { %s1495_s21 = smov %s1285_s30  ;;  %21 = sbr.rel (!%p19_p9) target bundleno = 6 (0x6), region = 95 }
 0x191   :  { %639 = vsyncpa [#allocation4], 1 }
 0x192   :  { %641 = vsyncpa [#allocation4 + $0x1], 1 }
 0x193   :  { %642 = vsyncpa [#allocation7], 1 }
 0x194   :  { %643 = vsyncpa [#allocation5], 1 }
 0x195   :  { %645 = vsyncpa [#allocation5 + $0x1], 1 }

</bundles_post_ra>
